<compile_context>
chip_gen: v7x
topology: tpu7x:2x2x1
jax: 0.10.0
libtpu: 0.0.40
codegen_flags: <defaults>
</compile_context>

<pallas_src>
import functools

import jax
import jax.numpy as jnp
from jax.experimental import pallas as pl
from jax.experimental.pallas import tpu as pltpu

# ----------------------------- module hyper-params ---------------------------
NONLINEAR = True
SECOND_LINEAR = True
NUMBER_EXTRALAYERS = 2

INPUT_DIM = 160     # e.g. N_features(4) * N_depth(8) * 5 (H,C,N,O,F)
OUTPUT_DIM = 64
BATCH = 128         # number of atoms / samples

LANE = 128          # TPU lane width -> lane-dense padded hidden/output width
MAX_TILE_M = 1024   # rows per grid step for very large batches


def _round_up(x, m):
    return (x + m - 1) // m * m


# --------------------------------- kernel ------------------------------------
def _mlp_kernel(x_ref, w1_ref, b1_ref, w2_ref, b2_ref, w3_ref, b3_ref, o_ref,
                *, nonlinear, second_linear, number_extralayers):
    # fc: bf16 operands -> f32 accumulation on the MXU; bias add + tanh in f32.
    h = jnp.dot(x_ref[...], w1_ref[...], preferred_element_type=jnp.float32)
    h = h + b1_ref[...]

    if nonlinear:
        h = jnp.tanh(h)                      # keep activations f32 (v5e: no bf16 EUP)

    if second_linear:
        h = jnp.dot(h.astype(w2_ref.dtype), w2_ref[...],
                    preferred_element_type=jnp.float32)
        h = h + b2_ref[...]

    # extra hidden layers: (tanh -> fc3), fc3 weights SHARED across iterations
    for _ in range(number_extralayers):
        h = jnp.tanh(h)
        h = jnp.dot(h.astype(w3_ref.dtype), w3_ref[...],
                    preferred_element_type=jnp.float32)
        h = h + b3_ref[...]

    o_ref[...] = h.astype(o_ref.dtype)


# -------------------------------- wrapper ------------------------------------
def pertcorrections_forward(x, params):
    """x: (N, INPUT_DIM) f32. params: w1,b1,w2,b2,w3,b3 (W as (in,out), b as (1,out))."""
    n, in_dim = x.shape
    out_dim = params["w1"].shape[1]
    out_pad = _round_up(out_dim, LANE)       # lane-dense hidden/output width

    # ---- pad params to lane-dense width, cast matmul operands to bf16 ----
    def pad_w(w, rows_to=None):
        r, c = w.shape
        rp = r if rows_to is None else rows_to
        return jnp.pad(w, ((0, rp - r), (0, out_pad - c))).astype(jnp.bfloat16)

    def pad_b(b):
        return jnp.pad(b, ((0, 0), (0, out_pad - b.shape[1]))).astype(jnp.float32)

    w1 = pad_w(params["w1"])                      # (in_dim, out_pad)
    w2 = pad_w(params["w2"], rows_to=out_pad)     # (out_pad, out_pad)
    w3 = pad_w(params["w3"], rows_to=out_pad)     # (out_pad, out_pad)
    b1, b2, b3 = pad_b(params["b1"]), pad_b(params["b2"]), pad_b(params["b3"])

    # ---- one big tile for small batches; cap rows/step for very large N ----
    # TODO(synk): on v7x prefer >=2 parallel grid steps so both TensorCores are used.
    tile_m = n if n <= MAX_TILE_M else MAX_TILE_M
    n_pad = _round_up(n, tile_m)
    xx = x.astype(jnp.bfloat16)
    if n_pad != n:
        xx = jnp.pad(xx, ((0, n_pad - n), (0, 0)))
    grid = (n_pad // tile_m,)

    kernel = functools.partial(
        _mlp_kernel,
        nonlinear=NONLINEAR,
        second_linear=SECOND_LINEAR,
        number_extralayers=NUMBER_EXTRALAYERS,
    )

    # advisory cost estimate for XLA scheduling around the custom call
    n_mm = 1 + (1 if SECOND_LINEAR else 0) + NUMBER_EXTRALAYERS
    n_tanh = (1 if NONLINEAR else 0) + NUMBER_EXTRALAYERS
    flops = 2 * n_pad * (in_dim * out_pad + (n_mm - 1) * out_pad * out_pad)
    transcendentals = n_tanh * n_pad * out_pad
    bytes_accessed = (xx.size * 2 + n_pad * out_pad * 4
                      + (w1.size + w2.size + w3.size) * 2
                      + (b1.size + b2.size + b3.size) * 4)
    cost = pl.CostEstimate(flops=flops, transcendentals=transcendentals,
                           bytes_accessed=bytes_accessed)

    # grid-invariant weights/biases -> constant block index
    rep2d = lambda shape: pl.BlockSpec(shape, lambda i: (0, 0))

    y = pl.pallas_call(
        kernel,
        out_shape=jax.ShapeDtypeStruct((n_pad, out_pad), jnp.float32),
        grid_spec=pltpu.PrefetchScalarGridSpec(
            num_scalar_prefetch=0,
            grid=grid,
            in_specs=[
                pl.BlockSpec((tile_m, in_dim), lambda i: (i, 0)),   # x tile (bf16)
                rep2d((in_dim, out_pad)),                           # w1
                rep2d((1, out_pad)),                                # b1
                rep2d((out_pad, out_pad)),                          # w2
                rep2d((1, out_pad)),                                # b2
                rep2d((out_pad, out_pad)),                          # w3
                rep2d((1, out_pad)),                                # b3
            ],
            out_specs=pl.BlockSpec((tile_m, out_pad), lambda i: (i, 0)),
        ),
        compiler_params=pltpu.CompilerParams(
            dimension_semantics=("parallel",)),
        cost_estimate=cost,
    )(xx, w1, b1, w2, b2, w3, b3)

    # strip row padding and the lane-padding columns (exactly zero by construction)
    return y[:n, :out_dim]


# ----------------------------- reference (pure JAX, f32) ----------------------
def reference_forward(x, p):
    h = x @ p["w1"] + p["b1"]
    if NONLINEAR:
        h = jnp.tanh(h)
    if SECOND_LINEAR:
        h = h @ p["w2"] + p["b2"]
    for _ in range(NUMBER_EXTRALAYERS):
        h = jnp.tanh(h)
        h = h @ p["w3"] + p["b3"]
    return h


# ------------------------------ param init -----------------------------------
def init_params(key):
    """Deterministic init mimicking torch.nn.Linear default (U[-1/sqrt(fan_in), +])."""
    ks = jax.random.split(key, 6)

    def linear(kw, kb, fan_in, fan_out):
        bound = 1.0 / jnp.sqrt(fan_in)
        w = jax.random.uniform(kw, (fan_in, fan_out), jnp.float32, -bound, bound)
        b = jax.random.uniform(kb, (1, fan_out), jnp.float32, -bound, bound)
        return w, b

    w1, b1 = linear(ks[0], ks[1], INPUT_DIM, OUTPUT_DIM)
    w2, b2 = linear(ks[2], ks[3], OUTPUT_DIM, OUTPUT_DIM)
    w3, b3 = linear(ks[4], ks[5], OUTPUT_DIM, OUTPUT_DIM)
    return {"w1": w1, "b1": b1, "w2": w2, "b2": b2, "w3": w3, "b3": b3}


# ---------------------------------- main --------------------------------------
if __name__ == "__main__":
    key = jax.random.PRNGKey(0)
    kx, kp = jax.random.split(key)

    x = jax.random.normal(kx, (BATCH, INPUT_DIM), jnp.float32)
    params = init_params(kp)

    y = pertcorrections_forward(x, params)
    y = jax.block_until_ready(y)

    y_ref = reference_forward(x, params)
    assert y.shape == (BATCH, OUTPUT_DIM)
    # matmul operands are bf16 inside the kernel -> relaxed tolerance vs f32 reference
    assert jnp.allclose(y, y_ref, atol=3e-2, rtol=3e-2), "mismatch vs reference"

    print("KERNEL_OK")
</pallas_src>

<mosaic_0001>
module attributes {stable_mosaic.version = 11 : i64} {
  func.func @_mlp_kernel(%arg0: i32, %arg1: memref<128x160xbf16, #tpu.memory_space<vmem>>, %arg2: memref<160x128xbf16, #tpu.memory_space<vmem>>, %arg3: memref<1x128xf32, #tpu.memory_space<vmem>>, %arg4: memref<128x128xbf16, #tpu.memory_space<vmem>>, %arg5: memref<1x128xf32, #tpu.memory_space<vmem>>, %arg6: memref<128x128xbf16, #tpu.memory_space<vmem>>, %arg7: memref<1x128xf32, #tpu.memory_space<vmem>>, %arg8: memref<128x128xf32, #tpu.memory_space<vmem>>) attributes {dimension_semantics = [#tpu.dimension_semantics<parallel>], iteration_bounds = array<i64: 1>, scalar_prefetch = 0 : i64, scratch_operands = 0 : i64, tpu.core_type = #tpu.core_type<tc>, window_params = [{transform_indices = @transform_0, window_bounds = array<i64: 128, 160>}, {pipeline_mode = #tpu.pipeline_mode<synchronous>, transform_indices = @transform_1, window_bounds = array<i64: 160, 128>}, {pipeline_mode = #tpu.pipeline_mode<synchronous>, transform_indices = @transform_2, window_bounds = array<i64: 1, 128>}, {pipeline_mode = #tpu.pipeline_mode<synchronous>, transform_indices = @transform_3, window_bounds = array<i64: 128, 128>}, {pipeline_mode = #tpu.pipeline_mode<synchronous>, transform_indices = @transform_4, window_bounds = array<i64: 1, 128>}, {pipeline_mode = #tpu.pipeline_mode<synchronous>, transform_indices = @transform_5, window_bounds = array<i64: 128, 128>}, {pipeline_mode = #tpu.pipeline_mode<synchronous>, transform_indices = @transform_6, window_bounds = array<i64: 1, 128>}, {transform_indices = @transform_7, window_bounds = array<i64: 128, 128>}]} {
    %c0 = arith.constant 0 : index
    %c0_0 = arith.constant 0 : index
    %0 = vector.load %arg1[%c0, %c0_0] : memref<128x160xbf16, #tpu.memory_space<vmem>>, vector<128x160xbf16>
    %c0_1 = arith.constant 0 : index
    %c0_2 = arith.constant 0 : index
    %1 = vector.load %arg2[%c0_1, %c0_2] : memref<160x128xbf16, #tpu.memory_space<vmem>>, vector<160x128xbf16>
    %cst = arith.constant dense<0.000000e+00> : vector<128x128xf32>
    %2 = tpu.matmul %0, %1, %cst {dimension_numbers = #tpu.dot_dimension_numbers<[1], [0], [0], [1], [0, 0, 1, 1], [], []>} : vector<128x160xbf16>, vector<160x128xbf16>, vector<128x128xf32> -> vector<128x128xf32>
    %c0_3 = arith.constant 0 : index
    %c0_4 = arith.constant 0 : index
    %3 = vector.load %arg3[%c0_3, %c0_4] : memref<1x128xf32, #tpu.memory_space<vmem>>, vector<1x128xf32>
    %4 = vector.broadcast %3 : vector<1x128xf32> to vector<128x128xf32>
    %5 = arith.addf %2, %4 : vector<128x128xf32>
    %6 = math.tanh %5 : vector<128x128xf32>
    %7 = arith.truncf %6 : vector<128x128xf32> to vector<128x128xbf16>
    %c0_5 = arith.constant 0 : index
    %c0_6 = arith.constant 0 : index
    %8 = vector.load %arg4[%c0_5, %c0_6] : memref<128x128xbf16, #tpu.memory_space<vmem>>, vector<128x128xbf16>
    %cst_7 = arith.constant dense<0.000000e+00> : vector<128x128xf32>
    %9 = tpu.matmul %7, %8, %cst_7 {dimension_numbers = #tpu.dot_dimension_numbers<[1], [0], [0], [1], [0, 0, 1, 1], [], []>} : vector<128x128xbf16>, vector<128x128xbf16>, vector<128x128xf32> -> vector<128x128xf32>
    %c0_8 = arith.constant 0 : index
    %c0_9 = arith.constant 0 : index
    %10 = vector.load %arg5[%c0_8, %c0_9] : memref<1x128xf32, #tpu.memory_space<vmem>>, vector<1x128xf32>
    %11 = vector.broadcast %10 : vector<1x128xf32> to vector<128x128xf32>
    %12 = arith.addf %9, %11 : vector<128x128xf32>
    %13 = math.tanh %12 : vector<128x128xf32>
    %14 = arith.truncf %13 : vector<128x128xf32> to vector<128x128xbf16>
    %c0_10 = arith.constant 0 : index
    %c0_11 = arith.constant 0 : index
    %15 = vector.load %arg6[%c0_10, %c0_11] : memref<128x128xbf16, #tpu.memory_space<vmem>>, vector<128x128xbf16>
    %cst_12 = arith.constant dense<0.000000e+00> : vector<128x128xf32>
    %16 = tpu.matmul %14, %15, %cst_12 {dimension_numbers = #tpu.dot_dimension_numbers<[1], [0], [0], [1], [0, 0, 1, 1], [], []>} : vector<128x128xbf16>, vector<128x128xbf16>, vector<128x128xf32> -> vector<128x128xf32>
    %c0_13 = arith.constant 0 : index
    %c0_14 = arith.constant 0 : index
    %17 = vector.load %arg7[%c0_13, %c0_14] : memref<1x128xf32, #tpu.memory_space<vmem>>, vector<1x128xf32>
    %18 = vector.broadcast %17 : vector<1x128xf32> to vector<128x128xf32>
    %19 = arith.addf %16, %18 : vector<128x128xf32>
    %20 = math.tanh %19 : vector<128x128xf32>
    %21 = arith.truncf %20 : vector<128x128xf32> to vector<128x128xbf16>
    %c0_15 = arith.constant 0 : index
    %c0_16 = arith.constant 0 : index
    %22 = vector.load %arg6[%c0_15, %c0_16] : memref<128x128xbf16, #tpu.memory_space<vmem>>, vector<128x128xbf16>
    %cst_17 = arith.constant dense<0.000000e+00> : vector<128x128xf32>
    %23 = tpu.matmul %21, %22, %cst_17 {dimension_numbers = #tpu.dot_dimension_numbers<[1], [0], [0], [1], [0, 0, 1, 1], [], []>} : vector<128x128xbf16>, vector<128x128xbf16>, vector<128x128xf32> -> vector<128x128xf32>
    %c0_18 = arith.constant 0 : index
    %c0_19 = arith.constant 0 : index
    %24 = vector.load %arg7[%c0_18, %c0_19] : memref<1x128xf32, #tpu.memory_space<vmem>>, vector<1x128xf32>
    %25 = vector.broadcast %24 : vector<1x128xf32> to vector<128x128xf32>
    %26 = arith.addf %23, %25 : vector<128x128xf32>
    %c0_20 = arith.constant 0 : index
    %c0_21 = arith.constant 0 : index
    %27 = vector.load %arg8[%c0_20, %c0_21] : memref<128x128xf32, #tpu.memory_space<vmem>>, vector<128x128xf32>
    tpu.vector_store %arg8[%c0_20, %c0_21], %26 {strides = array<i32>} : memref<128x128xf32, #tpu.memory_space<vmem>>, vector<128x128xf32>,
    return
  }
  func.func @transform_0(%arg0: i32) -> (i32, i32) {
    %c0_i32 = arith.constant 0 : i32
    %c0_i32_0 = arith.constant 0 : i32
    return %arg0, %c0_i32 : i32, i32
  }
  func.func @transform_1(%arg0: i32) -> (i32, i32) {
    %c0_i32 = arith.constant 0 : i32
    %c0_i32_0 = arith.constant 0 : i32
    %c0_i32_1 = arith.constant 0 : i32
    return %c0_i32, %c0_i32_0 : i32, i32
  }
  func.func @transform_2(%arg0: i32) -> (i32, i32) {
    %c0_i32 = arith.constant 0 : i32
    %c0_i32_0 = arith.constant 0 : i32
    %c0_i32_1 = arith.constant 0 : i32
    return %c0_i32, %c0_i32_0 : i32, i32
  }
  func.func @transform_3(%arg0: i32) -> (i32, i32) {
    %c0_i32 = arith.constant 0 : i32
    %c0_i32_0 = arith.constant 0 : i32
    %c0_i32_1 = arith.constant 0 : i32
    return %c0_i32, %c0_i32_0 : i32, i32
  }
  func.func @transform_4(%arg0: i32) -> (i32, i32) {
    %c0_i32 = arith.constant 0 : i32
    %c0_i32_0 = arith.constant 0 : i32
    %c0_i32_1 = arith.constant 0 : i32
    return %c0_i32, %c0_i32_0 : i32, i32
  }
  func.func @transform_5(%arg0: i32) -> (i32, i32) {
    %c0_i32 = arith.constant 0 : i32
    %c0_i32_0 = arith.constant 0 : i32
    %c0_i32_1 = arith.constant 0 : i32
    return %c0_i32, %c0_i32_0 : i32, i32
  }
  func.func @transform_6(%arg0: i32) -> (i32, i32) {
    %c0_i32 = arith.constant 0 : i32
    %c0_i32_0 = arith.constant 0 : i32
    %c0_i32_1 = arith.constant 0 : i32
    return %c0_i32, %c0_i32_0 : i32, i32
  }
  func.func @transform_7(%arg0: i32) -> (i32, i32) {
    %c0_i32 = arith.constant 0 : i32
    %c0_i32_0 = arith.constant 0 : i32
    return %arg0, %c0_i32 : i32, i32
  }
}

</mosaic_0001>

<bundles_post_ra>
// kernel: tpu_custom_call.1
= control target key start
LH: loop header
LB: loop body
LE: loop exit
PB: predicated region body
PF: predicated region fallthrough
CT: control target
= control target key end

     0   :  { %v1249_v1 = vmov 0   ;;  %vm203_vm0 = vcmask 261120   ;;  %s1582_s0 = inlined_call_operand.vmem [shape: bf16[128,160], index: 0, kind: input, shape index: {}]   ;;  %s1583_s1 = inlined_call_operand.vmem [shape: bf16[160,128], index: 1, kind: input, shape index: {}]   ;;  %s1584_s2 = inlined_call_operand.vmem [shape: f32[1,128], index: 2, kind: input, shape index: {}]   ;;  %s1585_s3 = inlined_call_operand.vmem [shape: bf16[128,128], index: 3, kind: input, shape index: {}]   ;;  %s1586_s4 = inlined_call_operand.vmem [shape: f32[1,128], index: 4, kind: input, shape index: {}]   ;;  %s1587_s5 = inlined_call_operand.vmem [shape: bf16[128,128], index: 5, kind: input, shape index: {}]   ;;  %s1588_s6 = inlined_call_operand.vmem [shape: f32[1,128], index: 6, kind: input, shape index: {}]   ;;  %s1589_s7 = inlined_call_operand.hbm [shape: f32[128,128], index: 7, kind: output, shape index: {}]  }
   0x1   :  { %v1079_v0 = vld [vmem:[%s1583_s1] sm:$0xff]   ;;  %228 = vmatprep.subr.bf16.mxu0 %v1249_v1  ;;  %v1080_v2 = vld [vmem:[%s1583_s1 + $0x8] sm:$0xff]   ;;  %v1081_v3 = vld [vmem:[%s1583_s1 + $0x10] sm:$0xff]  }
   0x2   :  { %229 = vmatpush1.bf16.msra.mxu0 %v1079_v0  ;;  %v1082_v4 = vld [vmem:[%s1583_s1 + $0x18] sm:$0xff]   ;;  %v1091_v5 = vld [vmem:[%s1582_s0 + $0x4] ss:$8 sps:$4 sm:$0xff]   ;;  %v1085_v9 = vld [vmem:[%s1583_s1 + $0x30] sm:$0xff]  }
   0x3   :  { %230 = vmatprep.subr.bf16.mxu0 %v1249_v1  ;;  %889 = vmatprep.mubr.msk.bf16.mxu0 %vm203_vm0, %v1091_v5  ;;  %v1083_v6 = vld [vmem:[%s1583_s1 + $0x20] sm:$0xff]   ;;  %v1084_v7 = vld [vmem:[%s1583_s1 + $0x28] sm:$0xff]   ;;  %v1086_v11 = vld [vmem:[%s1583_s1 + $0x38] sm:$0xff]  }
   0x4   :  { %v1113_v8 = vld [vmem:[%s1585_s3] sm:$0xff]   ;;  %v1114_v10 = vld [vmem:[%s1585_s3 + $0x8] sm:$0xff]  }
   0x5   :  { %963 = vmatprep.subr.bf16.mxu1 %v1113_v8  ;;  %v1087_v12 = vld [vmem:[%s1583_s1 + $0x40] sm:$0xff]  }
   0x6   :  { %231 = vmatpush1.bf16.msra.mxu0 %v1080_v2  ;;  %964 = vmatpush3.bf16.msra.mxu1 %v1113_v8 }
   0x7   :  { %232 = vmatprep.subr.bf16.mxu0 %v1249_v1  ;;  %965 = vmatprep.subr.bf16.mxu1 %v1114_v10 }
   0xa   :  { %233 = vmatpush1.bf16.msra.mxu0 %v1081_v3  ;;  %966 = vmatpush3.bf16.msra.mxu1 %v1114_v10 }
   0xb   :  { %234 = vmatprep.subr.bf16.mxu0 %v1249_v1 }
   0xe   :  { %235 = vmatpush1.bf16.msra.mxu0 %v1082_v4 }
   0xf   :  { %236 = vmatprep.subr.bf16.mxu0 %v1249_v1 }
  0x12   :  { %237 = vmatpush1.bf16.msra.mxu0 %v1083_v6 }
  0x13   :  { %238 = vmatprep.subr.bf16.mxu0 %v1249_v1 }
  0x16   :  { %239 = vmatpush1.bf16.msra.mxu0 %v1084_v7 }
  0x17   :  { %240 = vmatprep.subr.bf16.mxu0 %v1249_v1 }
  0x1a   :  { %241 = vmatpush1.bf16.msra.mxu0 %v1085_v9 }
  0x1b   :  { %242 = vmatprep.subr.bf16.mxu0 %v1249_v1 }
  0x1e   :  { %243 = vmatpush1.bf16.msra.mxu0 %v1086_v11 }
  0x1f   :  { %244 = vmatprep.subr.bf16.mxu0 %v1249_v1 }
  0x20   :  { %12 = vsyncpa [#allocation3], 0  ;;  %v1088_v13 = vld [vmem:[%s1583_s1 + $0x48] sm:$0xff]   ;;  %v1092_v15 = vld [vmem:[%s1582_s0 + $0x14] ss:$8 sps:$4 sm:$0xff]  }
  0x21   :  { %v1089_v14 = vld [vmem:[%s1582_s0] ss:$8 sps:$4 sm:$0xff]   ;;  %v1094_v16 = vld [vmem:[%s1582_s0 + $0x10] ss:$8 sps:$4 sm:$0xff]   ;;  %v1095_v17 = vld [vmem:[%s1582_s0 + $0x24] ss:$8 sps:$4 sm:$0xff]  }
  0x22   :  { %245 = vmatpush1.bf16.msra.mxu0 %v1087_v12  ;;  %v1097_v18 = vld [vmem:[%s1582_s0 + $0x20] ss:$8 sps:$4 sm:$0xff]   ;;  %v1098_v19 = vld [vmem:[%s1582_s0 + $0x34] ss:$8 sps:$4 sm:$0xff]   ;;  %v1100_v20 = vld [vmem:[%s1582_s0 + $0x30] ss:$8 sps:$4 sm:$0xff]  }
  0x23   :  { %246 = vmatprep.subr.bf16.mxu0 %v1249_v1  ;;  %v1101_v21 = vld [vmem:[%s1582_s0 + $0x44] ss:$8 sps:$4 sm:$0xff]   ;;  %v1103_v22 = vld [vmem:[%s1582_s0 + $0x40] ss:$8 sps:$4 sm:$0xff]   ;;  %v1104_v23 = vld [vmem:[%s1582_s0 + $0x54] ss:$8 sps:$4 sm:$0xff]  }
  0x24   :  { %v1106_v24 = vld [vmem:[%s1582_s0 + $0x50] ss:$8 sps:$4 sm:$0xff]   ;;  %v1107_v25 = vld [vmem:[%s1582_s0 + $0x64] ss:$8 sps:$4 sm:$0xff]   ;;  %v1109_v26 = vld [vmem:[%s1582_s0 + $0x60] ss:$8 sps:$4 sm:$0xff]  }
  0x25   :  { %v1110_v27 = vld [vmem:[%s1582_s0 + $0x74] ss:$8 sps:$4 sm:$0xff]   ;;  %v1112_v28 = vld [vmem:[%s1582_s0 + $0x70] ss:$8 sps:$4 sm:$0xff]   ;;  %v1117_v31 = vld [vmem:[%s1585_s3 + $0x20] sm:$0xff]  }
  0x26   :  { %247 = vmatpush1.bf16.msra.mxu0 %v1088_v13  ;;  %v1115_v29 = vld [vmem:[%s1585_s3 + $0x10] sm:$0xff]   ;;  %v1116_v30 = vld [vmem:[%s1585_s3 + $0x18] sm:$0xff]   ;;  %v1118_v32 = vld [vmem:[%s1585_s3 + $0x28] sm:$0xff]  }
  0x27   :  { %967 = vmatprep.subr.bf16.mxu1 %v1115_v29  ;;  %v1119_v33 = vld [vmem:[%s1585_s3 + $0x30] sm:$0xff]   ;;  %v1120_v34 = vld [vmem:[%s1585_s3 + $0x38] sm:$0xff]   ;;  %v1406_v35 = vld [vmem:[%s1587_s5] sm:$0xff]  }
  0x28   :  { %968 = vmatpush3.bf16.msra.mxu1 %v1115_v29  ;;  %v1412_v36 = vld [vmem:[%s1587_s5 + $0x8] sm:$0xff]   ;;  %1027 = vmatprep.subr.bf16.mxu0 %v1406_v35  ;;  %v1420_v37 = vld [vmem:[%s1587_s5 + $0x10] sm:$0xff]   ;;  %v1428_v38 = vld [vmem:[%s1584_s2] ss:$0 sm:$0xff] }
  0x29   :  { %261 = vmatmul.mubr.bf16.vlgmr.msra.gmra.mrb[0].mxu0 %v1089_v14  ;;  %969 = vmatprep.subr.bf16.mxu1 %v1116_v30 }
  0x2a   :  { %890 = vmatprep.mubr.msk.bf16.mxu0 %vm203_vm0, %v1092_v15  ;;  %1028 = vmatpush3.bf16.msra.mxu0 %v1406_v35 }
  0x2b   :  { %1029 = vmatprep.subr.bf16.mxu0 %v1412_v36 }
  0x2c   :  { %970 = vmatpush3.bf16.msra.mxu1 %v1116_v30 }
  0x2d   :  { %971 = vmatprep.subr.bf16.mxu1 %v1117_v31 }
  0x2e   :  { %1030 = vmatpush3.bf16.msra.mxu0 %v1412_v36 }
  0x2f   :  { %1031 = vmatprep.subr.bf16.mxu0 %v1420_v37 }
  0x30   :  { %972 = vmatpush3.bf16.msra.mxu1 %v1117_v31 }
  0x31   :  { %269 = vmatmul.mubr.bf16.gmra.mrb[4].mxu0 %v1094_v16  ;;  %973 = vmatprep.subr.bf16.mxu1 %v1118_v32 }
  0x32   :  { %891 = vmatprep.mubr.msk.bf16.mxu0 %vm203_vm0, %v1095_v17  ;;  %1032 = vmatpush3.bf16.msra.mxu0 %v1420_v37 }
  0x34   :  { %974 = vmatpush3.bf16.msra.mxu1 %v1118_v32 }
  0x35   :  { %975 = vmatprep.subr.bf16.mxu1 %v1119_v33 }
  0x38   :  { %976 = vmatpush3.bf16.msra.mxu1 %v1119_v33 }
  0x39   :  { %277 = vmatmul.mubr.bf16.gmra.mrb[8].mxu0 %v1097_v18  ;;  %977 = vmatprep.subr.bf16.mxu1 %v1120_v34 }
  0x3a   :  { %892 = vmatprep.mubr.msk.bf16.mxu0 %vm203_vm0, %v1098_v19 }
  0x3c   :  { %978 = vmatpush3.bf16.msra.mxu1 %v1120_v34 }
  0x3d   :  { %995 = vmatprep.subr.bf16.mxu1 %v1406_v35 }
  0x41   :  { %285 = vmatmul.mubr.bf16.gmra.mrb[12].mxu0 %v1100_v20 }
  0x42   :  { %893 = vmatprep.mubr.msk.bf16.mxu0 %vm203_vm0, %v1101_v21 }
  0x49   :  { %293 = vmatmul.mubr.bf16.gmra.mrb[16].mxu0 %v1103_v22 }
  0x4a   :  { %894 = vmatprep.mubr.msk.bf16.mxu0 %vm203_vm0, %v1104_v23 }
  0x51   :  { %301 = vmatmul.mubr.bf16.gmra.mrb[20].mxu0 %v1106_v24 }
  0x52   :  { %895 = vmatprep.mubr.msk.bf16.mxu0 %vm203_vm0, %v1107_v25 }
  0x59   :  { %309 = vmatmul.mubr.bf16.gmra.mrb[24].mxu0 %v1109_v26 }
  0x5a   :  { %896 = vmatprep.mubr.msk.bf16.mxu0 %vm203_vm0, %v1110_v27 }
  0x61   :  { %317 = vmatmul.mubr.bf16.gmra.mrb[28].mxu0 %v1112_v28 }
  0xfc   :  { %v262_v39 = vpop.f32.mrb[0].mxu0 }
  0xfd   :  { %v263_v40 = vadd.f32 %v1428_v38, %v262_v39  ;;  %v264_v41 = vpop.f32.mrb[1].mxu0 }
  0xfe   :  { %v265_v42 = vpop.f32.mrb[2].mxu0 }
  0xff   :  { %v266_v43 = vadd.f32 %v1428_v38, %v265_v42  ;;  %v267_v44 = vpop.f32.mrb[3].mxu0  ;;  %1129 = vtanh.f32 %v263_v40 }
 0x101   :  { %1131 = vtanh.f32 %v266_v43 }
 0x104   :  { %v270_v45 = vpop.f32.mrb[4].mxu0 }
 0x105   :  { %v271_v46 = vadd.f32 %v1428_v38, %v270_v45  ;;  %v272_v47 = vpop.f32.mrb[5].mxu0 }
 0x106   :  { %v273_v48 = vpop.f32.mrb[6].mxu0 }
 0x107   :  { %v274_v49 = vadd.f32 %v1428_v38, %v273_v48  ;;  %v275_v50 = vpop.f32.mrb[7].mxu0  ;;  %1133 = vtanh.f32 %v271_v46 }
 0x109   :  { %1135 = vtanh.f32 %v274_v49  ;;  %v1130_v51 = vpop.eup %1129 }
 0x10b   :  { %v1132_v52 = vpop.eup %1131 }
 0x10c   :  { %v278_v53 = vpop.f32.mrb[8].mxu0  ;;  %v341_v54 = vpack.c.bf16 %v1132_v52, %v1130_v51  ;;  %v1454_v51 = vld [vmem:[%s1587_s5 + $0x18] sm:$0xff]   ;;  %v1472_v52 = vld [vmem:[%s1587_s5 + $0x28] sm:$0xff]  }
 0x10d   :  { %v279_v55 = vadd.f32 %v1428_v38, %v278_v53  ;;  %v280_v56 = vpop.f32.mrb[9].mxu0  ;;  %1033 = vmatprep.subr.bf16.mxu0 %v1454_v51  ;;  %v1477_v53 = vld [vmem:[%s1587_s5 + $0x30] sm:$0xff]  }
 0x10e   :  { %v281_v57 = vpop.f32.mrb[10].mxu0  ;;  %979 = vmatprep.mubr.bf16.mxu1 %v341_v54  ;;  %1034 = vmatpush3.bf16.msra.mxu0 %v1454_v51  ;;  %v1490_v54 = vld [vmem:[%s1587_s5 + $0x38] sm:$0xff]  }
 0x10f   :  { %v282_v58 = vadd.f32 %v1428_v38, %v281_v57  ;;  %v283_v59 = vpop.f32.mrb[11].mxu0  ;;  %1137 = vtanh.f32 %v279_v55  ;;  %v1500_v55 = vld [vmem:[%s1586_s4] ss:$0 sm:$0xff] }
 0x111   :  { %1139 = vtanh.f32 %v282_v58  ;;  %v1134_v60 = vpop.eup %1133 }
 0x113   :  { %v1136_v61 = vpop.eup %1135 }
 0x114   :  { %v286_v62 = vpop.f32.mrb[12].mxu0  ;;  %v342_v63 = vpack.c.bf16 %v1136_v61, %v1134_v60 }
 0x115   :  { %v287_v0 = vadd.f32 %v1428_v38, %v286_v62  ;;  %v288_v1 = vpop.f32.mrb[13].mxu0 }
 0x116   :  { %v289_v2 = vpop.f32.mrb[14].mxu0  ;;  %980 = vmatmul.mubr.bf16.vlgmr.msra.gmra.mrb[0].mxu1 %v342_v63 }
 0x117   :  { %v290_v3 = vadd.f32 %v1428_v38, %v289_v2  ;;  %v291_v4 = vpop.f32.mrb[15].mxu0  ;;  %996 = vmatpush3.bf16.msra.mxu1 %v1406_v35  ;;  %1141 = vtanh.f32 %v287_v0 }
 0x118   :  { %997 = vmatprep.subr.bf16.mxu1 %v1412_v36 }
 0x119   :  { %1143 = vtanh.f32 %v290_v3  ;;  %v1138_v5 = vpop.eup %1137 }
 0x11b   :  { %v1140_v6 = vpop.eup %1139  ;;  %998 = vmatpush3.bf16.msra.mxu1 %v1412_v36 }
 0x11c   :  { %v294_v7 = vpop.f32.mrb[16].mxu0  ;;  %v343_v8 = vpack.c.bf16 %v1140_v6, %v1138_v5  ;;  %999 = vmatprep.subr.bf16.mxu1 %v1420_v37 }
 0x11d   :  { %v295_v9 = vadd.f32 %v1428_v38, %v294_v7  ;;  %v296_v10 = vpop.f32.mrb[17].mxu0 }
 0x11e   :  { %v297_v11 = vpop.f32.mrb[18].mxu0  ;;  %983 = vmatprep.mubr.bf16.mxu1 %v343_v8 }
 0x11f   :  { %v298_v12 = vadd.f32 %v1428_v38, %v297_v11  ;;  %v299_v13 = vpop.f32.mrb[19].mxu0  ;;  %1000 = vmatpush3.bf16.msra.mxu1 %v1420_v37  ;;  %1145 = vtanh.f32 %v295_v9 }
 0x120   :  { %1001 = vmatprep.subr.bf16.mxu1 %v1454_v51 }
 0x121   :  { %1147 = vtanh.f32 %v298_v12  ;;  %v1142_v14 = vpop.eup %1141 }
 0x123   :  { %v1144_v15 = vpop.eup %1143  ;;  %1002 = vmatpush3.bf16.msra.mxu1 %v1454_v51 }
 0x124   :  { %v302_v16 = vpop.f32.mrb[20].mxu0  ;;  %v344_v17 = vpack.c.bf16 %v1144_v15, %v1142_v14 }
 0x125   :  { %v303_v18 = vadd.f32 %v1428_v38, %v302_v16  ;;  %v304_v19 = vpop.f32.mrb[21].mxu0 }
 0x126   :  { %v305_v20 = vpop.f32.mrb[22].mxu0  ;;  %984 = vmatmul.mubr.bf16.gmra.mrb[4].mxu1 %v344_v17 }
 0x127   :  { %v306_v21 = vadd.f32 %v1428_v38, %v305_v20  ;;  %v307_v22 = vpop.f32.mrb[23].mxu0  ;;  %1149 = vtanh.f32 %v303_v18 }
 0x129   :  { %1151 = vtanh.f32 %v306_v21  ;;  %v1146_v23 = vpop.eup %1145 }
 0x12b   :  { %v1148_v24 = vpop.eup %1147 }
 0x12c   :  { %v310_v25 = vpop.f32.mrb[24].mxu0  ;;  %v345_v26 = vpack.c.bf16 %v1148_v24, %v1146_v23 }
 0x12d   :  { %v311_v27 = vadd.f32 %v1428_v38, %v310_v25  ;;  %v312_v28 = vpop.f32.mrb[25].mxu0 }
 0x12e   :  { %v313_v29 = vpop.f32.mrb[26].mxu0  ;;  %987 = vmatprep.mubr.bf16.mxu1 %v345_v26 }
 0x12f   :  { %v314_v30 = vadd.f32 %v1428_v38, %v313_v29  ;;  %v315_v31 = vpop.f32.mrb[27].mxu0  ;;  %1153 = vtanh.f32 %v311_v27 }
 0x131   :  { %1155 = vtanh.f32 %v314_v30  ;;  %v1150_v32 = vpop.eup %1149 }
 0x133   :  { %v1152_v33 = vpop.eup %1151 }
 0x134   :  { %v318_v34 = vpop.f32.mrb[28].mxu0  ;;  %v346_v39 = vpack.c.bf16 %v1152_v33, %v1150_v32 }
 0x135   :  { %v319_v40 = vadd.f32 %v1428_v38, %v318_v34  ;;  %v320_v41 = vpop.f32.mrb[29].mxu0 }
 0x136   :  { %v321_v42 = vpop.f32.mrb[30].mxu0  ;;  %988 = vmatmul.mubr.bf16.gmra.mrb[8].mxu1 %v346_v39 }
 0x137   :  { %v322_v43 = vadd.f32 %v1428_v38, %v321_v42  ;;  %v323_v44 = vpop.f32.mrb[31].mxu0  ;;  %1157 = vtanh.f32 %v319_v40  ;;  %v1463_v38 = vld [vmem:[%s1587_s5 + $0x20] sm:$0xff]  }
 0x138   :  { %1003 = vmatprep.subr.bf16.mxu1 %v1463_v38  ;;  %1035 = vmatprep.subr.bf16.mxu0 %v1463_v38 }
 0x139   :  { %1159 = vtanh.f32 %v322_v43  ;;  %v1154_v45 = vpop.eup %1153  ;;  %1004 = vmatpush3.bf16.msra.mxu1 %v1463_v38  ;;  %1036 = vmatpush3.bf16.msra.mxu0 %v1463_v38 }
 0x13a   :  { %1005 = vmatprep.subr.bf16.mxu1 %v1472_v52  ;;  %1037 = vmatprep.subr.bf16.mxu0 %v1472_v52 }
 0x13b   :  { %v1156_v46 = vpop.eup %1155 }
 0x13c   :  { %v347_v47 = vpack.c.bf16 %v1156_v46, %v1154_v45 }
 0x13d   :  { %1006 = vmatpush3.bf16.msra.mxu1 %v1472_v52  ;;  %1038 = vmatpush3.bf16.msra.mxu0 %v1472_v52 }
 0x13e   :  { %991 = vmatprep.mubr.bf16.mxu1 %v347_v47  ;;  %1007 = vmatprep.subr.bf16.mxu1 %v1477_v53 }
 0x13f   :  { %1039 = vmatprep.subr.bf16.mxu0 %v1477_v53 }
 0x141   :  { %v1158_v48 = vpop.eup %1157  ;;  %1008 = vmatpush3.bf16.msra.mxu1 %v1477_v53  ;;  %1040 = vmatpush3.bf16.msra.mxu0 %v1477_v53 }
 0x142   :  { %1009 = vmatprep.subr.bf16.mxu1 %v1490_v54  ;;  %1041 = vmatprep.subr.bf16.mxu0 %v1490_v54 }
 0x143   :  { %v1160_v49 = vpop.eup %1159 }
 0x144   :  { %v348_v50 = vpack.c.bf16 %v1160_v49, %v1158_v48  ;;  %v1536_v49 = vld [vmem:[%s1588_s6] ss:$0 sm:$0xff]  ;;  %s1250_s6 = smov [#allocation2]  }
 0x145   :  { %1010 = vmatpush3.bf16.msra.mxu1 %v1490_v54  ;;  %1042 = vmatpush3.bf16.msra.mxu0 %v1490_v54  ;;  %s851_s14 = sshll.u32 %s1250_s6, 4  ;;  %s852_s14 = int_to_ptr.vmem [resolvable:$true] %s851_s14 }
 0x146   :  { %992 = vmatmul.mubr.bf16.gmra.mrb[12].mxu1 %v348_v50  ;;  %1059 = vmatprep.subr.bf16.mxu1 %v1406_v35  ;;  %s1225_s0 = scalar_lea.vmem %s852_s14, 2048  ;;  %p1230_p1 = scmp.lt.s32.totalorder %s852_s14, %s852_s14 }
 0x147   :  { %p1226_p0 = scmp.ne.s32.totalorder %s852_s14, %s1225_s0  ;;  %p1231_p2 = scmp.lt.s32.totalorder %s1225_s0, %s1225_s0 }
 0x149   :  { %p1232_p3 = por %p1231_p2, %p1230_p1 }
 0x14b   :  { %p1233_p4 = pnand %p1232_p3, %p1226_p0 }
 0x1e9   :  { %v981_v56 = vpop.f32.mrb[0].mxu1 }
 0x1ea   :  { %v463_v57 = vadd.f32 %v981_v56, %v1500_v55  ;;  %v454_v58 = vpop.f32.mrb[1].mxu1 }
 0x1eb   :  { %v455_v59 = vadd.f32 %v1500_v55, %v454_v58  ;;  %v982_v60 = vpop.f32.mrb[2].mxu1 }
 0x1ec   :  { %1161 = vtanh.f32 %v463_v57  ;;  %v466_v61 = vadd.f32 %v982_v60, %v1500_v55  ;;  %v457_v62 = vpop.f32.mrb[3].mxu1 }
 0x1ed   :  { %1163 = vtanh.f32 %v455_v59  ;;  %v458_v63 = vadd.f32 %v1500_v55, %v457_v62 }
 0x1ee   :  { %1165 = vtanh.f32 %v466_v61 }
 0x1ef   :  { %1167 = vtanh.f32 %v458_v63 }
 0x1f6   :  { %v1162_v0 = vpop.eup %1161 }
 0x1f7   :  { %v1164_v1 = vpop.eup %1163 }
 0x1f8   :  { %v1166_v2 = vpop.eup %1165 }
 0x1f9   :  { %v1168_v3 = vpop.eup %1167  ;;  %v985_v4 = vpop.f32.mrb[4].mxu1  ;;  %v534_v5 = vpack.c.bf16 %v1166_v2, %v1162_v0 }
 0x1fa   :  { %v479_v6 = vadd.f32 %v985_v4, %v1500_v55  ;;  %v470_v7 = vpop.f32.mrb[5].mxu1  ;;  %v533_v8 = vpack.c.bf16 %v1168_v3, %v1164_v1 }
 0x1fb   :  { %v471_v9 = vadd.f32 %v1500_v55, %v470_v7  ;;  %v986_v10 = vpop.f32.mrb[6].mxu1 }
 0x1fc   :  { %1169 = vtanh.f32 %v479_v6  ;;  %v482_v11 = vadd.f32 %v986_v10, %v1500_v55  ;;  %v473_v12 = vpop.f32.mrb[7].mxu1  ;;  %1011 = vmatprep.mubr.bf16.mxu1 %v533_v8 }
 0x1fd   :  { %1171 = vtanh.f32 %v471_v9  ;;  %v474_v13 = vadd.f32 %v1500_v55, %v473_v12  ;;  %1012 = vmatmul.mubr.bf16.vlgmr.msra.gmra.mrb[16].mxu1 %v534_v5 }
 0x1fe   :  { %1173 = vtanh.f32 %v482_v11  ;;  %1067 = vmatpush3.bf16.msra.mxu1 %v1406_v35 }
 0x1ff   :  { %1175 = vtanh.f32 %v474_v13  ;;  %1060 = vmatprep.subr.bf16.mxu1 %v1412_v36 }
 0x202   :  { %1068 = vmatpush3.bf16.msra.mxu1 %v1412_v36 }
 0x203   :  { %1061 = vmatprep.subr.bf16.mxu1 %v1420_v37 }
 0x206   :  { %v1170_v14 = vpop.eup %1169  ;;  %1069 = vmatpush3.bf16.msra.mxu1 %v1420_v37 }
 0x207   :  { %v1172_v15 = vpop.eup %1171  ;;  %1062 = vmatprep.subr.bf16.mxu1 %v1454_v51 }
 0x208   :  { %v1174_v16 = vpop.eup %1173 }
 0x209   :  { %v1176_v17 = vpop.eup %1175  ;;  %v989_v18 = vpop.f32.mrb[8].mxu1  ;;  %v536_v19 = vpack.c.bf16 %v1174_v16, %v1170_v14 }
 0x20a   :  { %v495_v20 = vadd.f32 %v989_v18, %v1500_v55  ;;  %v486_v35 = vpop.f32.mrb[9].mxu1  ;;  %v535_v21 = vpack.c.bf16 %v1176_v17, %v1172_v15  ;;  %1070 = vmatpush3.bf16.msra.mxu1 %v1454_v51 }
 0x20b   :  { %v487_v36 = vadd.f32 %v1500_v55, %v486_v35  ;;  %v990_v22 = vpop.f32.mrb[10].mxu1  ;;  %1063 = vmatprep.subr.bf16.mxu1 %v1463_v38 }
 0x20c   :  { %1177 = vtanh.f32 %v495_v20  ;;  %v498_v37 = vadd.f32 %v990_v22, %v1500_v55  ;;  %v489_v23 = vpop.f32.mrb[11].mxu1  ;;  %1015 = vmatprep.mubr.bf16.mxu1 %v535_v21 }
 0x20d   :  { %1179 = vtanh.f32 %v487_v36  ;;  %v490_v24 = vadd.f32 %v1500_v55, %v489_v23  ;;  %1016 = vmatmul.mubr.bf16.gmra.mrb[20].mxu1 %v536_v19 }
 0x20e   :  { %1181 = vtanh.f32 %v498_v37  ;;  %1071 = vmatpush3.bf16.msra.mxu1 %v1463_v38 }
 0x20f   :  { %1183 = vtanh.f32 %v490_v24  ;;  %1064 = vmatprep.subr.bf16.mxu1 %v1472_v52 }
 0x212   :  { %1072 = vmatpush3.bf16.msra.mxu1 %v1472_v52 }
 0x213   :  { %1065 = vmatprep.subr.bf16.mxu1 %v1477_v53 }
 0x216   :  { %v1178_v25 = vpop.eup %1177  ;;  %1073 = vmatpush3.bf16.msra.mxu1 %v1477_v53 }
 0x217   :  { %v1180_v26 = vpop.eup %1179  ;;  %1066 = vmatprep.subr.bf16.mxu1 %v1490_v54 }
 0x218   :  { %v1182_v27 = vpop.eup %1181 }
 0x219   :  { %v1184_v28 = vpop.eup %1183  ;;  %v993_v29 = vpop.f32.mrb[12].mxu1  ;;  %v538_v30 = vpack.c.bf16 %v1182_v27, %v1178_v25 }
 0x21a   :  { %v511_v31 = vadd.f32 %v993_v29, %v1500_v55  ;;  %v502_v32 = vpop.f32.mrb[13].mxu1  ;;  %v537_v33 = vpack.c.bf16 %v1184_v28, %v1180_v26  ;;  %1074 = vmatpush3.bf16.msra.mxu1 %v1490_v54 }
 0x21b   :  { %v503_v34 = vadd.f32 %v1500_v55, %v502_v32  ;;  %v994_v39 = vpop.f32.mrb[14].mxu1 }
 0x21c   :  { %1185 = vtanh.f32 %v511_v31  ;;  %v514_v40 = vadd.f32 %v994_v39, %v1500_v55  ;;  %v505_v41 = vpop.f32.mrb[15].mxu1  ;;  %1019 = vmatprep.mubr.bf16.mxu1 %v537_v33 }
 0x21d   :  { %1187 = vtanh.f32 %v503_v34  ;;  %v506_v42 = vadd.f32 %v1500_v55, %v505_v41  ;;  %1020 = vmatmul.mubr.bf16.gmra.mrb[24].mxu1 %v538_v30 }
 0x21e   :  { %1189 = vtanh.f32 %v514_v40 }
 0x21f   :  { %1191 = vtanh.f32 %v506_v42 }
 0x226   :  { %v1186_v43 = vpop.eup %1185 }
 0x227   :  { %v1188_v44 = vpop.eup %1187 }
 0x228   :  { %v1190_v45 = vpop.eup %1189 }
 0x229   :  { %v1192_v46 = vpop.eup %1191  ;;  %v540_v47 = vpack.c.bf16 %v1190_v45, %v1186_v43 }
 0x22a   :  { %v539_v48 = vpack.c.bf16 %v1192_v46, %v1188_v44 }
 0x22c   :  { %1023 = vmatprep.mubr.bf16.mxu1 %v539_v48 }
 0x22d   :  { %1024 = vmatmul.mubr.bf16.gmra.mrb[28].mxu1 %v540_v47 }
 0x2d0   :  { %v1013_v50 = vpop.f32.mrb[16].mxu1 }
 0x2d1   :  { %v655_v51 = vadd.f32 %v1013_v50, %v1536_v49  ;;  %v646_v38 = vpop.f32.mrb[17].mxu1 }
 0x2d2   :  { %v647_v52 = vadd.f32 %v1536_v49, %v646_v38  ;;  %v1014_v53 = vpop.f32.mrb[18].mxu1 }
 0x2d3   :  { %1193 = vtanh.f32 %v655_v51  ;;  %v658_v54 = vadd.f32 %v1014_v53, %v1536_v49  ;;  %v649_v55 = vpop.f32.mrb[19].mxu1 }
 0x2d4   :  { %1195 = vtanh.f32 %v647_v52  ;;  %v650_v56 = vadd.f32 %v1536_v49, %v649_v55 }
 0x2d5   :  { %1197 = vtanh.f32 %v658_v54 }
 0x2d6   :  { %1199 = vtanh.f32 %v650_v56 }
 0x2dd   :  { %v1194_v57 = vpop.eup %1193 }
 0x2de   :  { %v1196_v58 = vpop.eup %1195 }
 0x2df   :  { %v1198_v59 = vpop.eup %1197 }
 0x2e0   :  { %v1200_v60 = vpop.eup %1199  ;;  %v1017_v61 = vpop.f32.mrb[20].mxu1  ;;  %v726_v62 = vpack.c.bf16 %v1198_v59, %v1194_v57 }
 0x2e1   :  { %v671_v63 = vadd.f32 %v1017_v61, %v1536_v49  ;;  %v662_v0 = vpop.f32.mrb[21].mxu1  ;;  %v725_v1 = vpack.c.bf16 %v1200_v60, %v1196_v58 }
 0x2e2   :  { %v663_v2 = vadd.f32 %v1536_v49, %v662_v0  ;;  %v1018_v3 = vpop.f32.mrb[22].mxu1 }
 0x2e3   :  { %1201 = vtanh.f32 %v671_v63  ;;  %v674_v4 = vadd.f32 %v1018_v3, %v1536_v49  ;;  %v665_v5 = vpop.f32.mrb[23].mxu1  ;;  %1043 = vmatprep.mubr.bf16.mxu0 %v725_v1 }
 0x2e4   :  { %1203 = vtanh.f32 %v663_v2  ;;  %v666_v6 = vadd.f32 %v1536_v49, %v665_v5  ;;  %1044 = vmatmul.mubr.bf16.vlgmr.msra.gmra.mrb[32].mxu0 %v726_v62 }
 0x2e5   :  { %1205 = vtanh.f32 %v674_v4 }
 0x2e6   :  { %1207 = vtanh.f32 %v666_v6 }
 0x2ed   :  { %v1202_v7 = vpop.eup %1201 }
 0x2ee   :  { %v1204_v8 = vpop.eup %1203 }
 0x2ef   :  { %v1206_v9 = vpop.eup %1205 }
 0x2f0   :  { %v1208_v10 = vpop.eup %1207  ;;  %v1021_v11 = vpop.f32.mrb[24].mxu1  ;;  %v728_v12 = vpack.c.bf16 %v1206_v9, %v1202_v7 }
 0x2f1   :  { %v687_v13 = vadd.f32 %v1021_v11, %v1536_v49  ;;  %v678_v14 = vpop.f32.mrb[25].mxu1  ;;  %v727_v15 = vpack.c.bf16 %v1208_v10, %v1204_v8 }
 0x2f2   :  { %v679_v16 = vadd.f32 %v1536_v49, %v678_v14  ;;  %v1022_v17 = vpop.f32.mrb[26].mxu1 }
 0x2f3   :  { %1209 = vtanh.f32 %v687_v13  ;;  %v690_v18 = vadd.f32 %v1022_v17, %v1536_v49  ;;  %v681_v19 = vpop.f32.mrb[27].mxu1  ;;  %1047 = vmatprep.mubr.bf16.mxu1 %v727_v15 }
 0x2f4   :  { %1211 = vtanh.f32 %v679_v16  ;;  %v682_v20 = vadd.f32 %v1536_v49, %v681_v19  ;;  %1048 = vmatmul.mubr.bf16.vlgmr.msra.gmra.mrb[32].mxu1 %v728_v12 }
 0x2f5   :  { %1213 = vtanh.f32 %v690_v18 }
 0x2f6   :  { %1215 = vtanh.f32 %v682_v20 }
 0x2fd   :  { %v1210_v35 = vpop.eup %1209 }
 0x2fe   :  { %v1212_v21 = vpop.eup %1211 }
 0x2ff   :  { %v1214_v36 = vpop.eup %1213 }
 0x300   :  { %v1216_v22 = vpop.eup %1215  ;;  %v1025_v37 = vpop.f32.mrb[28].mxu1  ;;  %v730_v23 = vpack.c.bf16 %v1214_v36, %v1210_v35 }
 0x301   :  { %v703_v24 = vadd.f32 %v1025_v37, %v1536_v49  ;;  %v694_v25 = vpop.f32.mrb[29].mxu1  ;;  %v729_v26 = vpack.c.bf16 %v1216_v22, %v1212_v21 }
 0x302   :  { %v695_v27 = vadd.f32 %v1536_v49, %v694_v25  ;;  %v1026_v28 = vpop.f32.mrb[30].mxu1 }
 0x303   :  { %1217 = vtanh.f32 %v703_v24  ;;  %v706_v29 = vadd.f32 %v1026_v28, %v1536_v49  ;;  %v697_v30 = vpop.f32.mrb[31].mxu1  ;;  %1051 = vmatprep.mubr.bf16.mxu1 %v729_v26 }
 0x304   :  { %1219 = vtanh.f32 %v695_v27  ;;  %v698_v31 = vadd.f32 %v1536_v49, %v697_v30  ;;  %1052 = vmatmul.mubr.bf16.gmra.mrb[36].mxu1 %v730_v23 }
 0x305   :  { %1221 = vtanh.f32 %v706_v29 }
 0x306   :  { %1223 = vtanh.f32 %v698_v31 }
 0x30d   :  { %v1218_v32 = vpop.eup %1217 }
 0x30e   :  { %v1220_v33 = vpop.eup %1219 }
 0x30f   :  { %v1222_v34 = vpop.eup %1221 }
 0x310   :  { %v1224_v39 = vpop.eup %1223  ;;  %v732_v40 = vpack.c.bf16 %v1222_v34, %v1218_v32 }
 0x311   :  { %v731_v41 = vpack.c.bf16 %v1224_v39, %v1220_v33 }
 0x313   :  { %1055 = vmatprep.mubr.bf16.mxu1 %v731_v41 }
 0x314   :  { %1056 = vmatmul.mubr.bf16.gmra.mrb[40].mxu1 %v732_v40 }
 0x3b7   :  { %v1045_v42 = vpop.f32.mrb[32].mxu0 }
 0x3b8   :  { %v776_v43 = vadd.f32 %v1045_v42, %v1536_v49  ;;  %v767_v44 = vpop.f32.mrb[33].mxu0 }
 0x3b9   :  { %v768_v45 = vadd.f32 %v1536_v49, %v767_v44  ;;  %v1046_v46 = vpop.f32.mrb[34].mxu0 }
 0x3ba   :  { %832 = vst [vmem:[#allocation2 + $0x10] sm:$0xff] %v776_v43  ;;  %v779_v47 = vadd.f32 %v1046_v46, %v1536_v49  ;;  %v770_v48 = vpop.f32.mrb[35].mxu0 }
 0x3bb   :  { %830 = vst [vmem:[#allocation2] sm:$0xff] %v768_v45  ;;  %v771_v50 = vadd.f32 %v1536_v49, %v770_v48 }
 0x3bc   :  { %833 = vst [vmem:[#allocation2 + $0x18] sm:$0xff] %v779_v47 }
 0x3bd   :  { %831 = vst [vmem:[#allocation2 + $0x8] sm:$0xff] %v771_v50 }
 0x3c7   :  { %v1049_v51 = vpop.f32.mrb[32].mxu1 }
 0x3c8   :  { %v792_v38 = vadd.f32 %v1049_v51, %v1536_v49  ;;  %v783_v52 = vpop.f32.mrb[33].mxu1 }
 0x3c9   :  { %v784_v53 = vadd.f32 %v1536_v49, %v783_v52  ;;  %v1050_v54 = vpop.f32.mrb[34].mxu1 }
 0x3ca   :  { %836 = vst [vmem:[#allocation2 + $0x30] sm:$0xff] %v792_v38  ;;  %v795_v55 = vadd.f32 %v1050_v54, %v1536_v49  ;;  %v786_v56 = vpop.f32.mrb[35].mxu1 }
 0x3cb   :  { %834 = vst [vmem:[#allocation2 + $0x20] sm:$0xff] %v784_v53  ;;  %v787_v57 = vadd.f32 %v1536_v49, %v786_v56 }
 0x3cc   :  { %837 = vst [vmem:[#allocation2 + $0x38] sm:$0xff] %v795_v55 }
 0x3cd   :  { %835 = vst [vmem:[#allocation2 + $0x28] sm:$0xff] %v787_v57 }
 0x3d7   :  { %v1053_v58 = vpop.f32.mrb[36].mxu1 }
 0x3d8   :  { %v808_v59 = vadd.f32 %v1053_v58, %v1536_v49  ;;  %v799_v60 = vpop.f32.mrb[37].mxu1 }
 0x3d9   :  { %v800_v61 = vadd.f32 %v1536_v49, %v799_v60  ;;  %v1054_v62 = vpop.f32.mrb[38].mxu1 }
 0x3da   :  { %840 = vst [vmem:[#allocation2 + $0x50] sm:$0xff] %v808_v59  ;;  %v811_v63 = vadd.f32 %v1054_v62, %v1536_v49  ;;  %v802_v0 = vpop.f32.mrb[39].mxu1 }
 0x3db   :  { %838 = vst [vmem:[#allocation2 + $0x40] sm:$0xff] %v800_v61  ;;  %v803_v1 = vadd.f32 %v1536_v49, %v802_v0 }
 0x3dc   :  { %841 = vst [vmem:[#allocation2 + $0x58] sm:$0xff] %v811_v63 }
 0x3dd   :  { %839 = vst [vmem:[#allocation2 + $0x48] sm:$0xff] %v803_v1 }
 0x3e7   :  { %v1057_v2 = vpop.f32.mrb[40].mxu1 }
 0x3e8   :  { %v824_v3 = vadd.f32 %v1057_v2, %v1536_v49  ;;  %v815_v4 = vpop.f32.mrb[41].mxu1 }
 0x3e9   :  { %v816_v5 = vadd.f32 %v1536_v49, %v815_v4  ;;  %v1058_v6 = vpop.f32.mrb[42].mxu1 }
 0x3ea   :  { %844 = vst [vmem:[#allocation2 + $0x70] sm:$0xff] %v824_v3  ;;  %v827_v7 = vadd.f32 %v1058_v6, %v1536_v49  ;;  %v818_v8 = vpop.f32.mrb[43].mxu1 }
 0x3eb   :  { %842 = vst [vmem:[#allocation2 + $0x60] sm:$0xff] %v816_v5  ;;  %v819_v9 = vadd.f32 %v1536_v49, %v818_v8 }
 0x3ec   :  { %845 = vst [vmem:[#allocation2 + $0x78] sm:$0xff] %v827_v7 }
 0x3ed   :  { %843 = vst [vmem:[#allocation2 + $0x68] sm:$0xff] %v819_v9 }
 0x3ee   :  { %1236 = shalt.err (!%p1233_p4)
}
 0x3ef   :  { %s1237_s17 = scalar_lea.hbm %s1589_s7, 2048 }
 0x3f0   :  { %p1238_p5 = scmp.ne.s32.totalorder %s1589_s7, %s1237_s17  ;;  %p1241_p6 = scmp.lt.u32.totalorder %s1237_s17, %s1589_s7 }
 0x3f2   :  { %p1243_p7 = pnand %p1241_p6, %p1238_p5 }
 0x3f4   :  { %1246 = shalt.err (!%p1243_p7)
}
 0x3f5   :  { %s1251_s22 = smov 128   ;;  %s1252_s23 = smov 8  }
 0x3f6   :  { %857 = dma.vmem_to_hbm [thread:$0]  %s852_s14, 2048, %s1589_s7, [#allocation3], %s1251_s22, %s1251_s22, %s1252_s23  }
 0x3f7   :  { %1247 = dma.done.wait [#allocation3], 2048  }
 0x3f8   :  { %1248 = vsyncadd [#allocation3], 4294965248 }
 0x3f9   :  { %861 = vsyncpa [#allocation3], 1 }

</bundles_post_ra>
